<compile_context>
chip_gen: v7x
topology: tpu7x:2x2x1
jax: 0.10.0
libtpu: 0.0.40
codegen_flags: <defaults>
</compile_context>

<pallas_src>
import functools

import jax
import jax.numpy as jnp
from jax import lax
from jax.experimental import pallas as pl
from jax.experimental.pallas import tpu as pltpu


def _round_up(x: int, m: int) -> int:
    return ((x + m - 1) // m) * m


def _lsq_scaled_sse_kernel(pred_ref, label_ref, out_ref, *, batch, tile_rows):
    """One grid step: SSE of (s_opt * pred - label) over one batch tile.

    pred_ref / label_ref : (TB, D) VMEM tiles (D = full feature dim, unpadded)
    out_ref              : (1, 8, 128) VMEM tile; whole tile set to this step's
                           partial SSE (lane-dense, unmasked, disjoint per step)
    """
    i = pl.program_id(0)

    p = pred_ref[...].astype(jnp.float32)   # (TB, D)
    g = label_ref[...].astype(jnp.float32)  # (TB, D)

    # Per-row least-squares scale: s = <p,g> / <p,p>.
    dot_pp = jnp.sum(p * p, axis=1, keepdims=True)   # (TB, 1)
    dot_pg = jnp.sum(p * g, axis=1, keepdims=True)   # (TB, 1)
    # Safe denominator: all-zero pred rows contribute sum(g^2) instead of NaN
    # (intentional divergence from PyTorch, which would NaN the whole mean).
    safe_pp = jnp.where(dot_pp > 0.0, dot_pp, jnp.float32(1.0))
    s = dot_pg / safe_pp                             # (TB, 1)

    # Explicit residual — numerically matches the PyTorch criterion.
    r = s * p - g                                    # (TB, D)
    sse_rows = jnp.sum(r * r, axis=1, keepdims=True)  # (TB, 1)

    # Mask rows of the ragged last tile (out-of-bounds rows hold garbage; the
    # select also kills any NaN/Inf that garbage might have produced).
    row = lax.broadcasted_iota(jnp.int32, sse_rows.shape, 0)
    valid = (i * tile_rows + row) < batch
    tile_sse = jnp.sum(jnp.where(valid, sse_rows, jnp.float32(0.0)))

    out_ref[...] = jnp.full(out_ref.shape, tile_sse, dtype=out_ref.dtype)


def _default_block_rows() -> int:
    # v7x: ~3.2 TB/s HBM and 32 MiB scoped-VMEM default -> bigger tiles pay off.
    # Elsewhere 4096 keeps double-buffered inputs ~8 MiB (v5e 16 MiB default).
    try:
        kind = jax.devices()[0].device_kind.lower()
    except Exception:  # pragma: no cover - defensive only
        kind = ""
    return 8192 if "v7" in kind else 4096


def criterion3dpose_leastsquares_scaled(pred, label, *, block_rows=None):
    """MSE( s_opt * pred , label ) with per-row least-squares-optimal scale.

    pred / label: (B, ...) with identical shapes; trailing dims are flattened,
    exactly like the module's view(batch_size, -1).
    """
    assert pred.shape == label.shape and pred.ndim >= 2
    B = pred.shape[0]
    pred2 = pred.reshape(B, -1)       # metadata-only reshape, no HBM pass
    label2 = label.reshape(B, -1)
    D = pred2.shape[1]

    if block_rows is None:
        block_rows = _default_block_rows()

    # Batch tile: multiple of the sublane packing for the input dtype.
    itemsize = jnp.dtype(pred2.dtype).itemsize
    sublane = {4: 8, 2: 16, 1: 32}.get(itemsize, 8)
    TB = min(_round_up(block_rows, sublane), _round_up(B, sublane))
    NT = pl.cdiv(B, TB)

    kernel = functools.partial(_lsq_scaled_sse_kernel, batch=B, tile_rows=TB)
    in_spec = pl.BlockSpec((TB, D), lambda i: (i, 0))

    partial = pl.pallas_call(
        kernel,
        out_shape=jax.ShapeDtypeStruct((NT, 8, 128), jnp.float32),
        grid_spec=pltpu.PrefetchScalarGridSpec(
            num_scalar_prefetch=0,
            grid=(NT,),
            in_specs=[in_spec, in_spec],
            out_specs=pl.BlockSpec((1, 8, 128), lambda i: (i, 0, 0)),
        ),
        compiler_params=pltpu.CompilerParams(
            dimension_semantics=("parallel",)),
    )(pred2, label2)

    # MSELoss(reduction='mean'): divide by the ORIGINAL element count B*D.
    return jnp.sum(partial[:, 0, 0]) / jnp.float32(B * D)


def _reference(pred, label):
    B = pred.shape[0]
    p = pred.reshape(B, -1).astype(jnp.float32)
    g = label.reshape(B, -1).astype(jnp.float32)
    dot_pp = jnp.sum(p * p, axis=1, keepdims=True)
    dot_pg = jnp.sum(p * g, axis=1, keepdims=True)
    s = dot_pg / dot_pp
    return jnp.mean((s * p - g) ** 2)


if __name__ == "__main__":
    key = jax.random.PRNGKey(0)
    k1, k2, k3, k4 = jax.random.split(key, 4)

    # Small shape consistent with the module: 17 joints * 3 coords per pose.
    B, J = 8, 17
    pred = jax.random.normal(k1, (B, J, 3), dtype=jnp.float32)
    label = jax.random.normal(k2, (B, J, 3), dtype=jnp.float32)
    loss = jax.block_until_ready(criterion3dpose_leastsquares_scaled(pred, label))
    ref = _reference(pred, label)
    assert jnp.allclose(loss, ref, rtol=1e-4, atol=1e-6), (loss, ref)

    # Multi-tile path with a ragged last tile (B not a multiple of the tile):
    # exercises the in-kernel row mask and the per-step partial-sum outputs.
    B2 = 250
    pred2 = jax.random.normal(k3, (B2, J, 3), dtype=jnp.float32)
    label2 = jax.random.normal(k4, (B2, J, 3), dtype=jnp.float32)
    loss2 = jax.block_until_ready(
        criterion3dpose_leastsquares_scaled(pred2, label2, block_rows=64))
    ref2 = _reference(pred2, label2)
    assert jnp.allclose(loss2, ref2, rtol=1e-4, atol=1e-6), (loss2, ref2)

    print("KERNEL_OK")
</pallas_src>

<mosaic_0001>
module attributes {stable_mosaic.version = 11 : i64} {
  func.func @_lsq_scaled_sse_kernel(%arg0: i32, %arg1: memref<8x51xf32, #tpu.memory_space<vmem>>, %arg2: memref<8x51xf32, #tpu.memory_space<vmem>>, %arg3: memref<1x8x128xf32, #tpu.memory_space<vmem>>) attributes {dimension_semantics = [#tpu.dimension_semantics<parallel>], iteration_bounds = array<i64: 1>, scalar_prefetch = 0 : i64, scratch_operands = 0 : i64, tpu.core_type = #tpu.core_type<tc>, window_params = [{transform_indices = @transform_0, window_bounds = array<i64: 8, 51>}, {transform_indices = @transform_1, window_bounds = array<i64: 8, 51>}, {transform_indices = @transform_2, window_bounds = array<i64: 1, 8, 128>}]} {
    %c0 = arith.constant 0 : index
    %c0_0 = arith.constant 0 : index
    %0 = vector.load %arg1[%c0, %c0_0] : memref<8x51xf32, #tpu.memory_space<vmem>>, vector<8x51xf32>
    %c0_1 = arith.constant 0 : index
    %c0_2 = arith.constant 0 : index
    %1 = vector.load %arg2[%c0_1, %c0_2] : memref<8x51xf32, #tpu.memory_space<vmem>>, vector<8x51xf32>
    %2 = arith.mulf %0, %0 : vector<8x51xf32>
    %cst = arith.constant dense<0.000000e+00> : vector<8xf32>
    %3 = vector.multi_reduction <add>, %2, %cst [1] : vector<8x51xf32> to vector<8xf32>
    %4 = vector.shape_cast %3 : vector<8xf32> to vector<8x1xf32>
    %5 = arith.mulf %0, %1 : vector<8x51xf32>
    %cst_3 = arith.constant dense<0.000000e+00> : vector<8xf32>
    %6 = vector.multi_reduction <add>, %5, %cst_3 [1] : vector<8x51xf32> to vector<8xf32>
    %7 = vector.shape_cast %6 : vector<8xf32> to vector<8x1xf32>
    %cst_4 = arith.constant 0.000000e+00 : f32
    %8 = vector.broadcast %cst_4 : f32 to vector<8x1xf32>
    %9 = arith.cmpf ogt, %4, %8 : vector<8x1xf32>
    %cst_5 = arith.constant 1.000000e+00 : f32
    %10 = vector.broadcast %cst_5 : f32 to vector<8x1xf32>
    %11 = arith.select %9, %4, %10 : vector<8x1xi1>, vector<8x1xf32>
    %12 = arith.divf %7, %11 : vector<8x1xf32>
    %13 = vector.broadcast %12 : vector<8x1xf32> to vector<8x51xf32>
    %14 = arith.mulf %13, %0 : vector<8x51xf32>
    %15 = arith.subf %14, %1 : vector<8x51xf32>
    %16 = arith.mulf %15, %15 : vector<8x51xf32>
    %cst_6 = arith.constant dense<0.000000e+00> : vector<8xf32>
    %17 = vector.multi_reduction <add>, %16, %cst_6 [1] : vector<8x51xf32> to vector<8xf32>
    %18 = vector.shape_cast %17 : vector<8xf32> to vector<8x1xf32>
    %19 = tpu.iota {dimensions = array<i32: 0>} : vector<8x1xi32>
    %c8_i32 = arith.constant 8 : i32
    %20 = arith.muli %arg0, %c8_i32 : i32
    %21 = vector.broadcast %20 : i32 to vector<8x1xi32>
    %22 = arith.addi %21, %19 : vector<8x1xi32>
    %c8_i32_7 = arith.constant 8 : i32
    %23 = vector.broadcast %c8_i32_7 : i32 to vector<8x1xi32>
    %24 = arith.cmpi slt, %22, %23 : vector<8x1xi32>
    %cst_8 = arith.constant 0.000000e+00 : f32
    %25 = vector.broadcast %cst_8 : f32 to vector<8x1xf32>
    %26 = arith.select %24, %18, %25 : vector<8x1xi1>, vector<8x1xf32>
    %27 = vector.shape_cast %26 : vector<8x1xf32> to vector<1x8x1xf32>
    %cst_9 = arith.constant dense<0.000000e+00> : vector<1xf32>
    %28 = vector.multi_reduction <add>, %27, %cst_9 [1, 2] : vector<1x8x1xf32> to vector<1xf32>
    %29 = vector.shape_cast %28 : vector<1xf32> to vector<1x1x1xf32>
    %30 = vector.extract %29[0, 0, 0] : f32 from vector<1x1x1xf32>
    %31 = vector.broadcast %30 : f32 to vector<1x8x128xf32>
    %c0_10 = arith.constant 0 : index
    %c0_11 = arith.constant 0 : index
    %c0_12 = arith.constant 0 : index
    %32 = vector.load %arg3[%c0_10, %c0_11, %c0_12] : memref<1x8x128xf32, #tpu.memory_space<vmem>>, vector<1x8x128xf32>
    tpu.vector_store %arg3[%c0_10, %c0_11, %c0_12], %31 {strides = array<i32>} : memref<1x8x128xf32, #tpu.memory_space<vmem>>, vector<1x8x128xf32>,
    return
  }
  func.func @transform_0(%arg0: i32) -> (i32, i32) {
    %c0_i32 = arith.constant 0 : i32
    %c0_i32_0 = arith.constant 0 : i32
    return %arg0, %c0_i32 : i32, i32
  }
  func.func @transform_1(%arg0: i32) -> (i32, i32) {
    %c0_i32 = arith.constant 0 : i32
    %c0_i32_0 = arith.constant 0 : i32
    return %arg0, %c0_i32 : i32, i32
  }
  func.func @transform_2(%arg0: i32) -> (i32, i32, i32) {
    %c0_i32 = arith.constant 0 : i32
    %c0_i32_0 = arith.constant 0 : i32
    %c0_i32_1 = arith.constant 0 : i32
    return %arg0, %c0_i32, %c0_i32_0 : i32, i32, i32
  }
}

</mosaic_0001>

<bundles_post_ra>
// kernel: tpu_custom_call.1
= control target key start
LH: loop header
LB: loop body
LE: loop exit
PB: predicated region body
PF: predicated region fallthrough
CT: control target
= control target key end

     0   :  { %7 = vsyncpa [#allocation3], 0  ;;  %s229_s0 = inlined_call_operand.hbm [shape: f32[8,51], index: 0, kind: input, shape index: {}]   ;;  %s230_s1 = inlined_call_operand.hbm [shape: f32[8,51], index: 1, kind: input, shape index: {}]   ;;  %s231_s2 = inlined_call_operand.hbm [shape: f32[1,8,128], index: 2, kind: output, shape index: {}]  }
   0x1   :  { %8 = vsyncpa [#allocation6], 0 }
   0x2   :  { %9 = vsyncpa [#allocation4], 0  ;;  %s172_s9 = smov [#allocation2]   ;;  %s173_s11 = smov [#allocation5]  }
   0x3   :  { %s16_s10 = sshll.u32 %s172_s9, 4  ;;  %s26_s12 = sshll.u32 %s173_s11, 4  ;;  %s17_s10 = int_to_ptr.vmem [resolvable:$true] %s16_s10  ;;  %s27_s12 = int_to_ptr.vmem [resolvable:$true] %s26_s12 }
   0x4   :  { %s100_s15 = scalar_lea.hbm %s229_s0, 128 }
   0x5   :  { %p101_p0 = scmp.ne.s32.totalorder %s229_s0, %s100_s15  ;;  %p104_p1 = scmp.lt.u32.totalorder %s100_s15, %s229_s0 }
   0x7   :  { %p106_p2 = pnand %p104_p1, %p101_p0 }
   0x9   :  { %109 = shalt.err (!%p106_p2)
}
   0xa   :  { %s110_s20 = scalar_lea.vmem %s17_s10, 128  ;;  %p115_p4 = scmp.lt.s32.totalorder %s17_s10, %s17_s10 }
   0xb   :  { %p111_p3 = scmp.ne.s32.totalorder %s17_s10, %s110_s20  ;;  %p116_p5 = scmp.lt.s32.totalorder %s110_s20, %s110_s20 }
   0xd   :  { %p117_p6 = por %p116_p5, %p115_p4 }
   0xf   :  { %p118_p7 = pnand %p117_p6, %p111_p3 }
  0x11   :  { %121 = shalt.err (!%p118_p7)
}
  0x12   :  { %19 = dma.hbm_to_vmem [thread:$0]  %s229_s0, 128, %s17_s10, [#allocation3]  }
  0x13   :  { %s122_s25 = scalar_lea.hbm %s230_s1, 128 }
  0x14   :  { %p123_p8 = scmp.ne.s32.totalorder %s230_s1, %s122_s25  ;;  %p126_p9 = scmp.lt.u32.totalorder %s122_s25, %s230_s1 }
  0x16   :  { %p128_p10 = pnand %p126_p9, %p123_p8 }
  0x18   :  { %131 = shalt.err (!%p128_p10)
}
  0x19   :  { %s132_s30 = scalar_lea.vmem %s27_s12, 128  ;;  %p137_p12 = scmp.lt.s32.totalorder %s27_s12, %s27_s12 }
  0x1a   :  { %p133_p11 = scmp.ne.s32.totalorder %s27_s12, %s132_s30  ;;  %p138_p13 = scmp.lt.s32.totalorder %s132_s30, %s132_s30 }
  0x1c   :  { %p139_p0 = por %p138_p13, %p137_p12 }
  0x1e   :  { %p140_p1 = pnand %p139_p0, %p133_p11 }
  0x20   :  { %143 = shalt.err (!%p140_p1)
}
  0x21   :  { %29 = dma.hbm_to_vmem [thread:$0]  %s230_s1, 128, %s27_s12, [#allocation6]  }
  0x22   :  { %166 = dma.done.wait [#allocation3], 128  }
  0x23   :  { %167 = vsyncadd [#allocation3], 4294967168 }
  0x24   :  { %168 = dma.done.wait [#allocation6], 128  }
  0x25   :  { %169 = vsyncadd [#allocation6], 4294967168  ;;  %v36_v0 = vld [vmem:[#allocation2] sm:$0xff]  ;;  %vm39_vm0 = vcmask 416768   ;;  %v37_v1 = vld [vmem:[#allocation5] sm:$0xff]  ;;  %vm64_vm2 = vcmask 7168  }
  0x26   :  { %v38_v2 = vmul.f32 %v36_v0, %v36_v0  ;;  %v43_v3 = vmul.f32 %v37_v1, %v36_v0  ;;  %s174_s1 = smov [#allocation7]  }
  0x27   :  { %s83_s4 = sshll.u32 %s174_s1, 4  ;;  %s84_s4 = int_to_ptr.vmem [resolvable:$true] %s83_s4 }
  0x28   :  { %v40_v4 = vsel %vm39_vm0, %v38_v2, 0.0  ;;  %v44_v5 = vsel %vm39_vm0, %v43_v3, 0.0  ;;  %s144_s6 = scalar_lea.vmem %s84_s4, 128  ;;  %p149_p3 = scmp.lt.s32.totalorder %s84_s4, %s84_s4 }
  0x29   :  { %41 = vadd.xlane.f32.xlu0 %v40_v4  ;;  %p145_p2 = scmp.ne.s32.totalorder %s84_s4, %s144_s6  ;;  %p150_p4 = scmp.lt.s32.totalorder %s144_s6, %s144_s6 }
  0x2b   :  { %p151_p5 = por %p150_p4, %p149_p3 }
  0x2d   :  { %45 = vadd.xlane.f32.xlu0 %v44_v5  ;;  %p152_p6 = pnand %p151_p5, %p145_p2 }
  0xb6   :  { %v42_v6 = vpop.xlane.xlu0 %41 }
  0xb7   :  { %vm47_vm1 = vcmp.gt.f32.partialorder %v42_v6, 0.0 }
  0xb8   :  { %v48_v7 = vsel %vm47_vm1, %v42_v6, 1.0 }
  0xb9   :  { %98 = vrcp.f32 %v48_v7 }
  0xba   :  { %v46_v8 = vpop.xlane.xlu0 %45 }
  0xc3   :  { %v99_v9 = vpop.eup %98 }
  0xc4   :  { %v50_v10 = vmul.f32 %v99_v9, %v46_v8 }
  0xc6   :  { %v51_v11 = vmul.f32 %v50_v10, %v36_v0 }
  0xc8   :  { %v52_v12 = vsub.f32 %v51_v11, %v37_v1 }
  0xca   :  { %v53_v13 = vmul.f32 %v52_v12, %v52_v12 }
  0xcc   :  { %v54_v14 = vsel %vm39_vm0, %v53_v13, 0.0 }
  0xcd   :  { %55 = vadd.xlane.f32.xlu1 %v54_v14 }
 0x15a   :  { %v56_v15 = vpop.xlane.xlu1 %55 }
 0x15b   :  { %v65_v16 = vsel %vm64_vm2, %v56_v15, 0.0 }
 0x15c   :  { %66 = vadd.xlane.f32.xlu1 %v65_v16 }
 0x1e9   :  { %v67_v17 = vpop.xlane.xlu1 %66 }
 0x1ea   :  { %v68_v18 = vrot.slane %v67_v17, 4 }
 0x1ec   :  { %v69_v19 = vadd.f32 %v68_v18, %v67_v17 }
 0x1ee   :  { %v70_v20 = vrot.slane %v69_v19, 2 }
 0x1f0   :  { %v71_v21 = vadd.f32 %v70_v20, %v69_v19 }
 0x1f2   :  { %v72_v22 = vrot.slane %v71_v21, 1 }
 0x1f4   :  { %v73_v23 = vadd.f32 %v72_v22, %v71_v21 }
 0x1f6   :  { %93 = vpush %v73_v23 }
 0x227   :  { %s94_s5 = spop %93 }
 0x228   :  { %v75_v24 = vstv %s94_s5 }
 0x229   :  { %76 = vst [vmem:[#allocation7] sm:$0xff] %v75_v24 }
 0x22a   :  { %155 = shalt.err (!%p152_p6)
}
 0x22b   :  { %s156_s9 = scalar_lea.hbm %s231_s2, 128 }
 0x22c   :  { %p157_p7 = scmp.ne.s32.totalorder %s231_s2, %s156_s9  ;;  %p160_p8 = scmp.lt.u32.totalorder %s156_s9, %s231_s2 }
 0x22e   :  { %p162_p9 = pnand %p160_p8, %p157_p7 }
 0x230   :  { %165 = shalt.err (!%p162_p9)
}
 0x231   :  { %86 = dma.vmem_to_hbm [thread:$0]  %s84_s4, 128, %s231_s2, [#allocation4]  }
 0x232   :  { %170 = dma.done.wait [#allocation4], 128  }
 0x233   :  { %171 = vsyncadd [#allocation4], 4294967168 }
 0x234   :  { %90 = vsyncpa [#allocation3], 1 }
 0x235   :  { %91 = vsyncpa [#allocation6], 1 }
 0x236   :  { %92 = vsyncpa [#allocation4], 1 }

</bundles_post_ra>
